<compile_context>
chip_gen: v6e
topology: v6e:2x2x1
jax: 0.10.0
libtpu: 0.0.40
codegen_flags: <defaults>
</compile_context>

<pallas_src>
import functools

import jax
import jax.numpy as jnp
from jax.experimental import pallas as pl
from jax.experimental.pallas import tpu as pltpu

_LANES = 128        # boxes per row of the packed view
_ROW_LANES = 512    # 4 components * 128 boxes -> lanes per row
_MAX_TR = 1024      # max rows (of 512 lanes) per grid step = 131072 boxes
_CHUNK = 32         # rows per inner-loop chunk (bounds vreg live ranges)
_SMALL_N = 2048     # below this, the fused XLA path wins (launch overhead)


def _round_up(a, b):
    return -(-a // b) * b


# ----------------------------------------------------------------------------
# pltpu.roll convention probe: find `dir` such that
#   pltpu.roll(x, shift=(dir * k) % L, axis=1)[..., l] == x[..., (l + k) % L]
# ----------------------------------------------------------------------------
_ROLL_DIR = None


def _lane_roll_dir():
    global _ROLL_DIR
    if _ROLL_DIR is None:
        def probe(x_ref, o_ref):
            o_ref[...] = pltpu.roll(x_ref[...], shift=1, axis=1)

        with jax.ensure_compile_time_eval():
            x = jnp.broadcast_to(jnp.arange(128, dtype=jnp.float32), (8, 128))
            y = pl.pallas_call(
                probe,
                out_shape=jax.ShapeDtypeStruct((8, 128), jnp.float32),
            )(x)
            first = float(y[0, 0])
        # jnp.roll convention: out[0] = in[127] -> need shift = -k  (dir = -1)
        # opposite convention: out[0] = in[1]   -> need shift = +k  (dir = +1)
        _ROLL_DIR = -1 if first > 64.0 else 1
    return _ROLL_DIR


# ----------------------------------------------------------------------------
# Kernel
# ----------------------------------------------------------------------------
def _make_kernel(loss_type, tr, roll_dir, n_valid, fused_sum):
    """Build the IoU/GIoU loss kernel for (tr, 512) interleaved blocks."""
    n_full, rem = divmod(tr, _CHUNK)

    def sh(v, k):
        # out[..., l] = v[..., (l + k) % 512]  (lane rotation, XLU)
        return pltpu.roll(v, shift=(roll_dir * k) % _ROW_LANES, axis=1)

    def chunk_loss(p, t):
        # p, t: (r, 512) f32, lane-interleaved [cx, cy, w, h] per box.
        # Only lanes l % 4 == 0 of the result are meaningful.
        p_sz = sh(p, 2)                      # (w, h) aligned onto (cx, cy) lanes
        t_sz = sh(t, 2)
        p_lo = p - 0.5 * p_sz
        p_hi = p + 0.5 * p_sz
        t_lo = t - 0.5 * t_sz
        t_hi = t + 0.5 * t_sz
        tl = jnp.maximum(p_lo, t_lo)         # lane 0: tl_x, lane 1: tl_y
        br = jnp.minimum(p_hi, t_hi)
        d = br - tl
        en = (tl < br).astype(jnp.float32)
        area_i = (d * sh(d, 1)) * (en * sh(en, 1))     # lane 0: intersection
        area_p = p_sz * sh(p, 3)                       # lane 0: w*h (pred)
        area_g = t_sz * sh(t, 3)                       # lane 0: w*h (target)
        area_u = area_p + area_g - area_i
        iou = area_i / (area_u + 1e-16)                # exact division
        if loss_type == "iou":
            return 1.0 - iou * iou
        # GIoU: reuse the hoisted corner sub-expressions.
        c_tl = jnp.minimum(p_lo, t_lo)
        c_br = jnp.maximum(p_hi, t_hi)
        dc = c_br - c_tl
        area_c = dc * sh(dc, 1)
        giou = iou - (area_c - area_u) / jnp.maximum(area_c, 1e-16)
        return 1.0 - jnp.clip(giou, -1.0, 1.0)

    def kernel(p_ref, t_ref, o_ref):
        base_row = pl.program_id(0) * tr

        def process(row_off, r, acc):
            p = p_ref[pl.ds(row_off, r), :]
            t = t_ref[pl.ds(row_off, r), :]
            loss = chunk_loss(p, t)
            if fused_sum:
                lane = jax.lax.broadcasted_iota(jnp.int32, (r, _ROW_LANES), 1)
                row = jax.lax.broadcasted_iota(jnp.int32, (r, _ROW_LANES), 0)
                box = (base_row + row_off + row) * _LANES + lane // 4
                valid = jnp.logical_and(lane % 4 == 0, box < n_valid)
                part = jnp.where(valid, loss, 0.0)
                return acc + jnp.sum(part, axis=0, keepdims=True)
            o_ref[pl.ds(row_off, r), :] = loss
            return acc

        acc = jnp.zeros((1, _ROW_LANES), jnp.float32)
        if n_full:
            acc = jax.lax.fori_loop(
                0, n_full,
                lambda c, a: process(pl.multiple_of(c * _CHUNK, _CHUNK),
                                     _CHUNK, a),
                acc)
        if rem:
            acc = process(n_full * _CHUNK, rem, acc)

        if fused_sum:
            row8 = jax.lax.broadcasted_iota(jnp.int32, (8, _ROW_LANES), 0)
            o_ref[...] = jnp.where(
                row8 == 0, jnp.broadcast_to(acc, (8, _ROW_LANES)), 0.0)

    return kernel


# ----------------------------------------------------------------------------
# Pallas wrapper
# ----------------------------------------------------------------------------
def _iou_loss_pallas(pred, target, loss_type, reduction, roll_dir):
    n = pred.shape[0]
    rows = pl.cdiv(n, _LANES)

    n_steps = pl.cdiv(rows, _MAX_TR)
    if n_steps == 1 and rows >= 64:
        n_steps = 2                  # let v7x's two TensorCores split the work
    if n_steps > 1 and n_steps % 2:
        n_steps += 1                 # even grid -> balanced megacore split
    tr = _round_up(pl.cdiv(rows, n_steps), 8)   # padding <= 8 rows per step
    rows_pad = n_steps * tr
    n_pad = rows_pad * _LANES

    if n_pad != n:
        # Only materialized when N is not tile-aligned; otherwise the reshape
        # below is a free bitcast and there is NO input packing pass at all.
        pred = jnp.pad(pred, ((0, n_pad - n), (0, 0)))
        target = jnp.pad(target, ((0, n_pad - n), (0, 0)))
    p = pred.reshape(rows_pad, _ROW_LANES)      # free row-major view
    t = target.reshape(rows_pad, _ROW_LANES)

    fused_sum = reduction in ("mean", "sum")
    kernel = _make_kernel(loss_type, tr, roll_dir, n, fused_sum)

    if fused_sum:
        out_shape = jax.ShapeDtypeStruct((n_steps * 8, _ROW_LANES), jnp.float32)
        out_spec = pl.BlockSpec((8, _ROW_LANES), lambda i: (i, 0))
    else:
        out_shape = jax.ShapeDtypeStruct((rows_pad, _ROW_LANES), jnp.float32)
        out_spec = pl.BlockSpec((tr, _ROW_LANES), lambda i: (i, 0))

    out = pl.pallas_call(
        kernel,
        out_shape=out_shape,
        grid=(n_steps,),
        in_specs=[pl.BlockSpec((tr, _ROW_LANES), lambda i: (i, 0)),
                  pl.BlockSpec((tr, _ROW_LANES), lambda i: (i, 0))],
        out_specs=out_spec,
        compiler_params=pltpu.CompilerParams(
            dimension_semantics=("parallel",),
            vmem_limit_bytes=32 * 1024 * 1024),
    )(p, t)

    if fused_sum:
        total = jnp.sum(out)                   # tiny (n_steps*8, 512) reduce
        return total / n if reduction == "mean" else total
    # Lane 4*j of row r holds the loss of box 128*r + j -> compact & trim pad.
    return out.reshape(-1, 4)[:n, 0]


def _iou_loss_dense(pred, target, loss_type):
    """Plain-JAX per-box loss (small-N fallback and test reference)."""
    pred = pred.reshape(-1, 4).astype(jnp.float32)
    target = target.reshape(-1, 4).astype(jnp.float32)
    tl = jnp.maximum(pred[:, :2] - pred[:, 2:] / 2,
                     target[:, :2] - target[:, 2:] / 2)
    br = jnp.minimum(pred[:, :2] + pred[:, 2:] / 2,
                     target[:, :2] + target[:, 2:] / 2)
    area_p = jnp.prod(pred[:, 2:], axis=1)
    area_g = jnp.prod(target[:, 2:], axis=1)
    en = jnp.prod((tl < br).astype(tl.dtype), axis=1)
    area_i = jnp.prod(br - tl, axis=1) * en
    area_u = area_p + area_g - area_i
    iou = area_i / (area_u + 1e-16)
    if loss_type == "iou":
        return 1.0 - iou ** 2
    c_tl = jnp.minimum(pred[:, :2] - pred[:, 2:] / 2,
                       target[:, :2] - target[:, 2:] / 2)
    c_br = jnp.maximum(pred[:, :2] + pred[:, 2:] / 2,
                       target[:, :2] + target[:, 2:] / 2)
    area_c = jnp.prod(c_br - c_tl, axis=1)
    giou = iou - (area_c - area_u) / jnp.maximum(area_c, 1e-16)
    return 1.0 - jnp.clip(giou, -1.0, 1.0)


@functools.partial(jax.jit,
                   static_argnames=("reduction", "loss_type", "roll_dir",
                                    "use_pallas"))
def _iou_loss_impl(pred, target, *, reduction, loss_type, roll_dir, use_pallas):
    pred = pred.reshape(-1, 4).astype(jnp.float32)
    target = target.reshape(-1, 4).astype(jnp.float32)
    if use_pallas:
        loss = _iou_loss_pallas(pred, target, loss_type, reduction, roll_dir)
        return loss  # reduction (if any) already fused into the kernel path
    loss = _iou_loss_dense(pred, target, loss_type)
    if reduction == "mean":
        return loss.mean()
    if reduction == "sum":
        return loss.sum()
    return loss


def iou_loss(pred, target, reduction="none", loss_type="iou", use_pallas=None):
    """Pallas implementation of IOUloss.forward (boxes are cx, cy, w, h)."""
    assert pred.shape[0] == target.shape[0]
    if loss_type not in ("iou", "giou"):
        raise ValueError(f"unknown loss_type {loss_type}")
    n = pred.size // 4
    if use_pallas is None:
        # Re-derived crossover: with the packing pass removed and the reduction
        # fused, the kernel path only loses to the fused-XLA graph at tiny N
        # where launch overhead dominates.
        use_pallas = n >= _SMALL_N
    roll_dir = _lane_roll_dir() if use_pallas else 1
    return _iou_loss_impl(pred, target, reduction=reduction,
                          loss_type=loss_type, roll_dir=roll_dir,
                          use_pallas=bool(use_pallas))


if __name__ == "__main__":
    # IOUloss has no learnable parameters; only synthetic box inputs needed.
    key = jax.random.PRNGKey(0)
    k1, k2, k3, k4 = jax.random.split(key, 4)
    n_boxes = 8400  # standard YOLOX anchor count for a 640x640 input

    pred_xy = jax.random.uniform(k1, (n_boxes, 2), minval=0.0, maxval=10.0)
    pred_wh = jax.random.uniform(k2, (n_boxes, 2), minval=0.5, maxval=4.0)
    tgt_xy = jax.random.uniform(k3, (n_boxes, 2), minval=0.0, maxval=10.0)
    tgt_wh = jax.random.uniform(k4, (n_boxes, 2), minval=0.5, maxval=4.0)
    pred = jnp.concatenate([pred_xy, pred_wh], axis=1)
    target = jnp.concatenate([tgt_xy, tgt_wh], axis=1)

    # 1) default module config: reduction='none', loss_type='iou'
    #    (Pallas path; unaligned N exercises the bounded-padding branch)
    loss = iou_loss(pred, target, reduction="none", loss_type="iou")
    jax.block_until_ready(loss)
    ref = _iou_loss_dense(pred, target, "iou")
    assert loss.shape == (n_boxes,)
    assert jnp.allclose(loss, ref, atol=1e-5, rtol=1e-5)

    # 2) 'giou' + fused in-kernel 'sum' reduction (Pallas path)
    loss_g = iou_loss(pred, target, reduction="sum", loss_type="giou")
    jax.block_until_ready(loss_g)
    ref_g = _iou_loss_dense(pred, target, "giou").sum()
    assert jnp.allclose(loss_g, ref_g, rtol=1e-4, atol=1e-2)

    # 3) tile-aligned N -> completely copy-free input views + fused 'mean'
    m = 8192
    loss_m = iou_loss(pred[:m], target[:m], reduction="mean", loss_type="giou")
    jax.block_until_ready(loss_m)
    ref_m = _iou_loss_dense(pred[:m], target[:m], "giou").mean()
    assert jnp.allclose(loss_m, ref_m, rtol=1e-4, atol=1e-4)

    # 4) tiny-N case exercises the small-N XLA fallback
    loss_s = iou_loss(pred[:200], target[:200], reduction="mean",
                      loss_type="iou")
    jax.block_until_ready(loss_s)
    ref_s = _iou_loss_dense(pred[:200], target[:200], "iou").mean()
    assert jnp.allclose(loss_s, ref_s, atol=1e-6, rtol=1e-6)

    print("KERNEL_OK")
</pallas_src>

<mosaic_0001>
module attributes {stable_mosaic.version = 11 : i64} {
  func.func @probe(%arg0: memref<8x128xf32, #tpu.memory_space<vmem>>, %arg1: memref<8x128xf32, #tpu.memory_space<vmem>>) attributes {dimension_semantics = [], scalar_prefetch = 0 : i64, scratch_operands = 0 : i64, tpu.core_type = #tpu.core_type<tc>} {
    %c0 = arith.constant 0 : index
    %c0_0 = arith.constant 0 : index
    %0 = vector.load %arg0[%c0, %c0_0] : memref<8x128xf32, #tpu.memory_space<vmem>>, vector<8x128xf32>
    %c1_i32 = arith.constant 1 : i32
    %1 = tpu.dynamic_rotate %0 by %c1_i32 dim 1 : vector<8x128xf32>, i32 -> vector<8x128xf32>
    %c0_1 = arith.constant 0 : index
    %c0_2 = arith.constant 0 : index
    %2 = vector.load %arg1[%c0_1, %c0_2] : memref<8x128xf32, #tpu.memory_space<vmem>>, vector<8x128xf32>
    tpu.vector_store %arg1[%c0_1, %c0_2], %1 {strides = array<i32>} : memref<8x128xf32, #tpu.memory_space<vmem>>, vector<8x128xf32>,
    return
  }
}

</mosaic_0001>

<bundles_post_ra>
// kernel: tpu_custom_call.1
= control target key start
LH: loop header
LB: loop body
LE: loop exit
PB: predicated region body
PF: predicated region fallthrough
CT: control target
= control target key end

     0   :  { %6 = vsyncpa [#allocation3], 0  ;;  %s106_s0 = inlined_call_operand.hbm [shape: f32[8,128], index: 0, kind: input, shape index: {}]   ;;  %s107_s1 = inlined_call_operand.hbm [shape: f32[8,128], index: 1, kind: output, shape index: {}]  }
   0x1   :  { %7 = vsyncpa [#allocation4], 0  ;;  %s87_s6 = smov [#allocation2]  }
   0x2   :  { %s14_s7 = sshll.u32 %s87_s6, 4  ;;  %s15_s7 = int_to_ptr.vmem [resolvable:$true] %s14_s7 }
   0x3   :  { %s51_s8 = scalar_lea.vmem %s15_s7, 128  ;;  %p56_p1 = scmp.lt.s32.totalorder %s15_s7, %s15_s7 }
   0x4   :  { %p52_p0 = scmp.ne.s32.totalorder %s15_s7, %s51_s8  ;;  %p57_p2 = scmp.lt.s32.totalorder %s51_s8, %s51_s8 }
   0x6   :  { %p58_p3 = por %p57_p2, %p56_p1 }
   0x8   :  { %p59_p4 = pnand %p58_p3, %p52_p0 }
   0xa   :  { %62 = shalt.err (!%p59_p4)
}
   0xb   :  { %17 = dma.hbm_to_vmem [thread:$0]  %s106_s0, 128, %s15_s7, [#allocation3]  }
   0xc   :  { %83 = dma.done.wait [#allocation3], 128  }
   0xd   :  { %84 = vsyncadd [#allocation3], 4294967168  ;;  %v21_v0 = vld [vmem:[#allocation2] sm:$0xff]  ;;  %s88_s11 = smov 1   ;;  %s89_s12 = smov [#allocation5]  }
   0xe   :  { %22 = vrot.lane.b32.xlu0 %v21_v0, %s88_s11  ;;  %s31_s13 = sshll.u32 %s89_s12, 4  ;;  %s32_s13 = int_to_ptr.vmem [resolvable:$true] %s31_s13 }
   0xf   :  { %s63_s14 = scalar_lea.vmem %s32_s13, 128  ;;  %p68_p6 = scmp.lt.s32.totalorder %s32_s13, %s32_s13 }
  0x10   :  { %p64_p5 = scmp.ne.s32.totalorder %s32_s13, %s63_s14  ;;  %p69_p7 = scmp.lt.s32.totalorder %s63_s14, %s63_s14 }
  0x12   :  { %p70_p8 = por %p69_p7, %p68_p6 }
  0x14   :  { %p71_p9 = pnand %p70_p8, %p64_p5 }
  0x80   :  { %v23_v1 = vpop.permute.xlu0 %22 }
  0x81   :  { %24 = vst [vmem:[#allocation5] sm:$0xff] %v23_v1 }
  0x82   :  { %74 = shalt.err (!%p71_p9)
}
  0x83   :  { %34 = dma.vmem_to_hbm [thread:$0]  %s32_s13, 128, %s107_s1, [#allocation4]  }
  0x84   :  { %85 = dma.done.wait [#allocation4], 128  }
  0x85   :  { %86 = vsyncadd [#allocation4], 4294967168 }
  0x86   :  { %38 = vsyncpa [#allocation3], 1 }
  0x87   :  { %39 = vsyncpa [#allocation4], 1 }

</bundles_post_ra>
